<compile_context>
chip_gen: v5e
topology: v5e:2x2
jax: 0.10.0
libtpu: 0.0.40
codegen_flags: <defaults>
</compile_context>

<pallas_src>
import functools

import jax
import jax.numpy as jnp
from jax.experimental import pallas as pl
from jax.experimental.pallas import tpu as pltpu


def _triplet_kernel(margin, block_rows, want_scores,
                    x_ref, xt_ref, sqn_ref, labr_ref, labc_ref, *out_refs):
    """One anchor-row block: (TM, D) anchor rows against all N columns."""
    if want_scores:
        scores_ref, per_ref = out_refs
    else:
        (per_ref,) = out_refs

    i = pl.program_id(0)
    x = x_ref[...].astype(jnp.float32)                      # (TM, D)
    xt = xt_ref[...].astype(jnp.float32)                    # (D, N)
    tm, d = x.shape
    n = xt.shape[1]

    # Gram-matrix formulation -> MXU matmul.  Clamp at 0 before the /D to
    # guard against tiny negative values from cancellation.
    # (For v6e one could cast the matmul operands to bf16 for ~2x MXU
    #  throughput; kept f32 here to stay within the exact-reference tolerance.)
    gram = jnp.dot(x, xt, preferred_element_type=jnp.float32)          # (TM, N)
    sqn_row = jnp.sum(x * x, axis=1, keepdims=True)                    # (TM, 1)
    sqn_col = sqn_ref[...]                                             # (1, N)
    scores = jnp.maximum(sqn_row + sqn_col - 2.0 * gram, 0.0) / jnp.float32(d)

    if want_scores:
        scores_ref[...] = scores

    # Masks built only on this (TM, N) tile (cheap VPU filler under the MXU).
    same = labc_ref[...] == labr_ref[...]                              # (TM, N)
    row = jax.lax.broadcasted_iota(jnp.int32, (tm, n), 0) + i * block_rows
    col = jax.lax.broadcasted_iota(jnp.int32, (tm, n), 1)
    diag = row == col
    pos_mask = jnp.logical_and(same, jnp.logical_not(diag))            # same class, j != i
    neg_mask = jnp.logical_not(same)                                   # different class

    # hardest_negative:  clamp is monotone, so
    #   max_{g,n} clamp(Gs[g] - Is[n] + m, 0) == clamp(max_g Gs - min_n Is + m, 0)
    g_max = jnp.max(jnp.where(pos_mask, scores, -jnp.inf), axis=1, keepdims=True)
    i_min = jnp.min(jnp.where(neg_mask, scores, jnp.inf), axis=1, keepdims=True)
    per_ref[...] = jnp.maximum(g_max - i_min + jnp.float32(margin), 0.0)


def _pallas_triplet(embeddings, labels, margin, *, block_rows=None, want_scores=True):
    n, d = embeddings.shape
    if block_rows is None:
        block_rows = 128 if n % 128 == 0 else (8 if n % 8 == 0 else n)
    assert n % block_rows == 0, "N must be divisible by the row block size"
    tm = block_rows

    emb = embeddings.astype(jnp.float32)
    emb_t = emb.T                                       # (D, N), transposed once outside
    sqn = jnp.sum(emb * emb, axis=1).reshape(1, n)      # (1, N) squared norms
    lab = labels.astype(jnp.int32)
    lab_row = lab.reshape(1, n)
    lab_col = lab.reshape(n, 1)

    kernel = functools.partial(_triplet_kernel, float(margin), tm, want_scores)

    in_specs = [
        pl.BlockSpec((tm, d), lambda i: (i, 0)),        # anchor rows of x
        pl.BlockSpec((d, n), lambda i: (0, 0)),         # x^T, resident across grid
        pl.BlockSpec((1, n), lambda i: (0, 0)),         # squared norms (row vector)
        pl.BlockSpec((1, n), lambda i: (0, 0)),         # labels as a row
        pl.BlockSpec((tm, 1), lambda i: (i, 0)),        # labels for this row block
    ]
    per_spec = pl.BlockSpec((tm, 1), lambda i: (i, 0))
    per_shape = jax.ShapeDtypeStruct((n, 1), jnp.float32)
    if want_scores:
        out_shape = (jax.ShapeDtypeStruct((n, n), jnp.float32), per_shape)
        out_specs = (pl.BlockSpec((tm, n), lambda i: (i, 0)), per_spec)
    else:
        out_shape = per_shape
        out_specs = per_spec

    out = pl.pallas_call(
        kernel,
        out_shape=out_shape,
        grid=(n // tm,),
        in_specs=in_specs,
        out_specs=out_specs,
        compiler_params=pltpu.CompilerParams(
            dimension_semantics=("parallel",)),
    )(emb, emb_t, sqn, lab_row, lab_col)

    if want_scores:
        scores, per_anchor = out
        return scores, per_anchor
    return None, out


def triplet_loss(embeddings, labels, margin=0.5, samples_per_class=2,
                 negative_selection_fn="hardest_negative", block_rows=None):
    """Mirrors TripletLoss.forward: returns (loss, Gs, Is)."""
    if negative_selection_fn != "hardest_negative":
        # TODO(synk): semihard_negative selection (reference impl is broken torch.ByteTensor code)
        raise NotImplementedError
    n, _ = embeddings.shape
    scores, per_anchor = _pallas_triplet(embeddings, labels, margin,
                                         block_rows=block_rows, want_scores=True)
    loss = jnp.mean(per_anchor)

    # Glue: reproduce the row-major boolean-mask gathers that build Gs / Is.
    lab = labels.astype(jnp.int32)
    in_class = lab.reshape(n, 1) == lab.reshape(1, n)
    eye = jnp.eye(n, dtype=bool)
    pos_mask = in_class & (~eye)
    neg_mask = ~in_class

    def take_masked(mask, k):
        # Masked entries of each row, in increasing column order (stable sort).
        order = jnp.argsort(~mask, axis=1, stable=True)
        return jnp.take_along_axis(scores, order[:, :k], axis=1)

    gs = take_masked(pos_mask, samples_per_class - 1)       # (N, perclass-1)
    is_ = take_masked(neg_mask, n - samples_per_class)      # (N, N-perclass)
    return loss, gs, is_


def triplet_loss_only(embeddings, labels, margin=0.5, block_rows=None):
    """Fast path: skips the O(N^2) Scores HBM writeback when Gs/Is are unused."""
    _, per_anchor = _pallas_triplet(embeddings, labels, margin,
                                    block_rows=block_rows, want_scores=False)
    return jnp.mean(per_anchor)


def triplet_loss_ref(embeddings, labels, margin=0.5, samples_per_class=2):
    """Pure-JAX reference replicating the PyTorch forward (hardest_negative)."""
    x = embeddings.astype(jnp.float32)
    n, d = x.shape
    scores = jnp.sum((x[None, :, :] - x[:, None, :]) ** 2, axis=2) / d
    in_class = labels.reshape(n, 1) == labels.reshape(1, n)
    eye = jnp.eye(n, dtype=bool)
    pos_mask = in_class & (~eye)
    neg_mask = ~in_class

    def take_masked(mask, k):
        order = jnp.argsort(~mask, axis=1, stable=True)
        return jnp.take_along_axis(scores, order[:, :k], axis=1)

    gs = take_masked(pos_mask, samples_per_class - 1)
    is_ = take_masked(neg_mask, n - samples_per_class)
    loss_values = jnp.maximum(gs[:, :, None] - is_[:, None, :] + margin, 0.0)
    loss = jnp.mean(jnp.max(jnp.max(loss_values, axis=2), axis=1))
    return loss, gs, is_


if __name__ == "__main__":
    key = jax.random.PRNGKey(0)
    N, D = 16, 32                    # 8 classes x 2 samples per class
    MARGIN = 0.5
    embeddings = jax.random.normal(key, (N, D), dtype=jnp.float32)
    labels = jnp.repeat(jnp.arange(8, dtype=jnp.int32), 2)

    # Full forward (loss, Gs, Is) -- exercises the row-tiled grid (2 blocks).
    loss, gs, is_ = triplet_loss(embeddings, labels, margin=MARGIN,
                                 samples_per_class=2, block_rows=8)
    # Loss-only fast path (no Scores writeback).
    loss_fast = triplet_loss_only(embeddings, labels, margin=MARGIN, block_rows=8)
    jax.block_until_ready((loss, gs, is_, loss_fast))

    loss_ref, gs_ref, is_ref = triplet_loss_ref(embeddings, labels, margin=MARGIN,
                                                samples_per_class=2)
    assert jnp.allclose(loss, loss_ref, atol=1e-5, rtol=1e-5), (loss, loss_ref)
    assert jnp.allclose(loss_fast, loss_ref, atol=1e-5, rtol=1e-5), (loss_fast, loss_ref)
    assert jnp.allclose(gs, gs_ref, atol=1e-5, rtol=1e-5)
    assert jnp.allclose(is_, is_ref, atol=1e-5, rtol=1e-5)
    assert gs.shape == (N, 1) and is_.shape == (N, N - 2)
    print("KERNEL_OK")
</pallas_src>

<mosaic_0001>
module attributes {stable_mosaic.version = 11 : i64} {
  func.func @_triplet_kernel(%arg0: i32, %arg1: memref<8x32xf32, #tpu.memory_space<vmem>>, %arg2: memref<32x16xf32, #tpu.memory_space<vmem>>, %arg3: memref<1x16xf32, #tpu.memory_space<vmem>>, %arg4: memref<1x16xi32, #tpu.memory_space<vmem>>, %arg5: memref<8x1xi32, #tpu.memory_space<vmem>>, %arg6: memref<8x16xf32, #tpu.memory_space<vmem>>, %arg7: memref<8x1xf32, #tpu.memory_space<vmem>>) attributes {dimension_semantics = [#tpu.dimension_semantics<parallel>], iteration_bounds = array<i64: 2>, scalar_prefetch = 0 : i64, scratch_operands = 0 : i64, tpu.core_type = #tpu.core_type<tc>, window_params = [{transform_indices = @transform_0, window_bounds = array<i64: 8, 32>}, {pipeline_mode = #tpu.pipeline_mode<synchronous>, transform_indices = @transform_1, window_bounds = array<i64: 32, 16>}, {pipeline_mode = #tpu.pipeline_mode<synchronous>, transform_indices = @transform_2, window_bounds = array<i64: 1, 16>}, {pipeline_mode = #tpu.pipeline_mode<synchronous>, transform_indices = @transform_3, window_bounds = array<i64: 1, 16>}, {transform_indices = @transform_4, window_bounds = array<i64: 8, 1>}, {transform_indices = @transform_5, window_bounds = array<i64: 8, 16>}, {transform_indices = @transform_6, window_bounds = array<i64: 8, 1>}]} {
    %c0 = arith.constant 0 : index
    %c0_0 = arith.constant 0 : index
    %0 = vector.load %arg1[%c0, %c0_0] : memref<8x32xf32, #tpu.memory_space<vmem>>, vector<8x32xf32>
    %c0_1 = arith.constant 0 : index
    %c0_2 = arith.constant 0 : index
    %1 = vector.load %arg2[%c0_1, %c0_2] : memref<32x16xf32, #tpu.memory_space<vmem>>, vector<32x16xf32>
    %cst = arith.constant dense<0.000000e+00> : vector<8x16xf32>
    %2 = tpu.matmul %0, %1, %cst {dimension_numbers = #tpu.dot_dimension_numbers<[1], [0], [0], [1], [0, 0, 1, 1], [], []>} : vector<8x32xf32>, vector<32x16xf32>, vector<8x16xf32> -> vector<8x16xf32>
    %3 = arith.mulf %0, %0 : vector<8x32xf32>
    %cst_3 = arith.constant dense<0.000000e+00> : vector<8xf32>
    %4 = vector.multi_reduction <add>, %3, %cst_3 [1] : vector<8x32xf32> to vector<8xf32>
    %5 = vector.shape_cast %4 : vector<8xf32> to vector<8x1xf32>
    %c0_4 = arith.constant 0 : index
    %c0_5 = arith.constant 0 : index
    %6 = vector.load %arg3[%c0_4, %c0_5] : memref<1x16xf32, #tpu.memory_space<vmem>>, vector<1x16xf32>
    %7 = vector.broadcast %5 : vector<8x1xf32> to vector<8x16xf32>
    %8 = vector.broadcast %6 : vector<1x16xf32> to vector<8x16xf32>
    %9 = arith.addf %7, %8 : vector<8x16xf32>
    %cst_6 = arith.constant 2.000000e+00 : f32
    %10 = vector.broadcast %cst_6 : f32 to vector<8x16xf32>
    %11 = arith.mulf %10, %2 : vector<8x16xf32>
    %12 = arith.subf %9, %11 : vector<8x16xf32>
    %cst_7 = arith.constant 0.000000e+00 : f32
    %13 = vector.broadcast %cst_7 : f32 to vector<8x16xf32>
    %14 = arith.maximumf %12, %13 : vector<8x16xf32>
    %cst_8 = arith.constant 3.200000e+01 : f32
    %15 = vector.broadcast %cst_8 : f32 to vector<8x16xf32>
    %16 = arith.divf %14, %15 : vector<8x16xf32>
    %c0_9 = arith.constant 0 : index
    %c0_10 = arith.constant 0 : index
    %17 = vector.load %arg6[%c0_9, %c0_10] : memref<8x16xf32, #tpu.memory_space<vmem>>, vector<8x16xf32>
    tpu.vector_store %arg6[%c0_9, %c0_10], %16 {strides = array<i32>} : memref<8x16xf32, #tpu.memory_space<vmem>>, vector<8x16xf32>,
    %c0_11 = arith.constant 0 : index
    %c0_12 = arith.constant 0 : index
    %18 = vector.load %arg5[%c0_11, %c0_12] : memref<8x1xi32, #tpu.memory_space<vmem>>, vector<8x1xi32>
    %c0_13 = arith.constant 0 : index
    %c0_14 = arith.constant 0 : index
    %19 = vector.load %arg4[%c0_13, %c0_14] : memref<1x16xi32, #tpu.memory_space<vmem>>, vector<1x16xi32>
    %20 = vector.broadcast %18 : vector<8x1xi32> to vector<8x16xi32>
    %21 = vector.broadcast %19 : vector<1x16xi32> to vector<8x16xi32>
    %22 = arith.cmpi eq, %20, %21 : vector<8x16xi32>
    %23 = tpu.iota {dimensions = array<i32: 0>} : vector<8x16xi32>
    %c8_i32 = arith.constant 8 : i32
    %24 = arith.muli %arg0, %c8_i32 : i32
    %25 = vector.broadcast %24 : i32 to vector<8x16xi32>
    %26 = arith.addi %23, %25 : vector<8x16xi32>
    %27 = tpu.iota {dimensions = array<i32: 1>} : vector<8x16xi32>
    %28 = arith.cmpi eq, %26, %27 : vector<8x16xi32>
    %cst_15 = arith.constant dense<true> : vector<8x16xi1>
    %29 = arith.xori %28, %cst_15 : vector<8x16xi1>
    %30 = arith.andi %22, %29 : vector<8x16xi1>
    %cst_16 = arith.constant dense<true> : vector<8x16xi1>
    %31 = arith.xori %22, %cst_16 : vector<8x16xi1>
    %cst_17 = arith.constant 0xFF800000 : f32
    %32 = vector.broadcast %cst_17 : f32 to vector<8x16xf32>
    %33 = arith.select %30, %16, %32 : vector<8x16xi1>, vector<8x16xf32>
    %cst_18 = arith.constant dense<0xFF800000> : vector<8xf32>
    %34 = vector.multi_reduction <maximumf>, %33, %cst_18 [1] : vector<8x16xf32> to vector<8xf32>
    %35 = vector.shape_cast %34 : vector<8xf32> to vector<8x1xf32>
    %cst_19 = arith.constant 0x7F800000 : f32
    %36 = vector.broadcast %cst_19 : f32 to vector<8x16xf32>
    %37 = arith.select %31, %16, %36 : vector<8x16xi1>, vector<8x16xf32>
    %cst_20 = arith.constant dense<0x7F800000> : vector<8xf32>
    %38 = vector.multi_reduction <minimumf>, %37, %cst_20 [1] : vector<8x16xf32> to vector<8xf32>
    %39 = vector.shape_cast %38 : vector<8xf32> to vector<8x1xf32>
    %40 = arith.subf %35, %39 : vector<8x1xf32>
    %cst_21 = arith.constant 5.000000e-01 : f32
    %41 = vector.broadcast %cst_21 : f32 to vector<8x1xf32>
    %42 = arith.addf %40, %41 : vector<8x1xf32>
    %cst_22 = arith.constant 0.000000e+00 : f32
    %43 = vector.broadcast %cst_22 : f32 to vector<8x1xf32>
    %44 = arith.maximumf %42, %43 : vector<8x1xf32>
    %c0_23 = arith.constant 0 : index
    %c0_24 = arith.constant 0 : index
    %45 = vector.load %arg7[%c0_23, %c0_24] : memref<8x1xf32, #tpu.memory_space<vmem>>, vector<8x1xf32>
    tpu.vector_store %arg7[%c0_23, %c0_24], %44 {strides = array<i32>} : memref<8x1xf32, #tpu.memory_space<vmem>>, vector<8x1xf32>,
    return
  }
  func.func @transform_0(%arg0: i32) -> (i32, i32) {
    %c0_i32 = arith.constant 0 : i32
    %c0_i32_0 = arith.constant 0 : i32
    return %arg0, %c0_i32 : i32, i32
  }
  func.func @transform_1(%arg0: i32) -> (i32, i32) {
    %c0_i32 = arith.constant 0 : i32
    %c0_i32_0 = arith.constant 0 : i32
    %c0_i32_1 = arith.constant 0 : i32
    return %c0_i32, %c0_i32_0 : i32, i32
  }
  func.func @transform_2(%arg0: i32) -> (i32, i32) {
    %c0_i32 = arith.constant 0 : i32
    %c0_i32_0 = arith.constant 0 : i32
    %c0_i32_1 = arith.constant 0 : i32
    return %c0_i32, %c0_i32_0 : i32, i32
  }
  func.func @transform_3(%arg0: i32) -> (i32, i32) {
    %c0_i32 = arith.constant 0 : i32
    %c0_i32_0 = arith.constant 0 : i32
    %c0_i32_1 = arith.constant 0 : i32
    return %c0_i32, %c0_i32_0 : i32, i32
  }
  func.func @transform_4(%arg0: i32) -> (i32, i32) {
    %c0_i32 = arith.constant 0 : i32
    %c0_i32_0 = arith.constant 0 : i32
    return %arg0, %c0_i32 : i32, i32
  }
  func.func @transform_5(%arg0: i32) -> (i32, i32) {
    %c0_i32 = arith.constant 0 : i32
    %c0_i32_0 = arith.constant 0 : i32
    return %arg0, %c0_i32 : i32, i32
  }
  func.func @transform_6(%arg0: i32) -> (i32, i32) {
    %c0_i32 = arith.constant 0 : i32
    %c0_i32_0 = arith.constant 0 : i32
    return %arg0, %c0_i32 : i32, i32
  }
}

</mosaic_0001>

<bundles_post_ra>
// kernel: tpu_custom_call.1
= control target key start
LH: loop header
LB: loop body
LE: loop exit
PB: predicated region body
PF: predicated region fallthrough
CT: control target
= control target key end

     0   :  { %12 = vsyncpa [#allocation3], 0  ;;  %s769_s0 = inlined_call_operand.vmem [shape: f32[16,32], index: 0, kind: input, shape index: {}]   ;;  %s770_s1 = inlined_call_operand.vmem [shape: f32[32,16], index: 1, kind: input, shape index: {}]   ;;  %s771_s2 = inlined_call_operand.vmem [shape: f32[1,16], index: 2, kind: input, shape index: {}]   ;;  %s772_s3 = inlined_call_operand.vmem [shape: s32[1,16], index: 3, kind: input, shape index: {}]   ;;  %s773_s4 = inlined_call_operand.vmem [shape: s32[16,1], index: 4, kind: input, shape index: {}]   ;;  %s774_s5 = inlined_call_operand.hbm [shape: f32[16,16], index: 5, kind: output, shape index: {0}]   ;;  %s775_s6 = inlined_call_operand.vmem [shape: f32[16,1], index: 6, kind: output, shape index: {1}]  }
   0x1   :  { %14 = vsyncpa [#allocation3 + $0x1], 0  ;;  %s638_s21 = smov 0   ;;  %s640_s22 = smov 0  }
   0x2   :  { %s642_s23 = smov 0   ;;  %s644_s24 = smov 0  }
   0x3 LB: > { %s659_s25 = sadd.s32 4294967295, %s598_s24   ;;  %s475_s26 = sadd.s32 4294967294, %s598_s24   ;;  %s598_s24 = sphi %s644_s24, %s783_s24   ;;  %s594_s23 = sphi %s642_s23, %s782_s23   ;;  %s590_s22 = sphi %s640_s22, %s781_s22   ;;  %s586_s21 = sphi %s638_s21, %s780_s21  }
   0x4   : > { %s663_s27 = sadd.s32 1, %s598_s24   ;;  %s142_s28 = sadd.s32 1, %s594_s23 }
   0x5   : > { %s139_s29 = ssub.s32 %s598_s24, %s663_s27  ;;  %p152_p0 = scmp.ne.s32.totalorder %s594_s23, %s590_s22 }
   0x6   : > { %p140_p1 = scmp.eq.s32.totalorder %s139_s29, 0  ;;  %p153_p2 = scmp.eq.s32.totalorder %s659_s25, 1 }
   0x7   : > { %p158_p3 = scmp.ne.s32.totalorder %s590_s22, %s586_s21  ;;  %p159_p4 = scmp.eq.s32.totalorder %s475_s26, 1 }
   0x8   : > { %s674_s30 = scalar_select %p140_p1, %s594_s23, %s142_s28  }
   0x9   : > { %p676_p5 = por %p153_p2, %p152_p0  ;;  %p680_p6 = por %p159_p4, %p158_p3 }
   0xa   : > { %p478_p7 = scmp.ge.s32.totalorder %s598_s24, 1  ;;  %p226_p8 = scmp.lt.s32.totalorder %s598_s24, 3 }
   0xc   : > { %p227_p9 = pnand %p478_p7, %p226_p8 }
   0xd   : > { %p263_p10 = scmp.lt.s32.totalorder (!%p227_p9), %s659_s25, 1  ;;  %s484_s12 = sshll.u32 (!%p227_p9), %s659_s25, 3 }
   0xe   : > { %230 = sbr.rel (%p227_p9) target bundleno = 297 (0x129), region = 40  ;;  %s254_s13 = sand.u32 (!%p227_p9), 1, %s590_s22  }
   0xf   : > { %s479_s14 = sshll.u32 (!%p227_p9), %s254_s13, 3 }
  0x10   : > { %s256_s17 = scalar_lea.vmem (!%p227_p9), [#allocation2], %s479_s14  ;;  %s556_s14 = scalar_lea.hbm (!%p227_p9), %s774_s5, 16 }
  0x11   : > { %s374_s28 = sshll.u32 (!%p227_p9), %s256_s17, 4  ;;  %s375_s28 = int_to_ptr.vmem [resolvable:$true] %s374_s28 }
  0x13   : > { %v279_v0 = vld [vmem:[%s770_s1 + $0x18] sm:$0xff]  ;;  %v278_v1 = vld [vmem:[%s770_s1 + $0x10] sm:$0xff]  ;;  %v600_v2 = vmov 0   ;;  %v277_v3 = vld [vmem:[%s770_s1 + $0x8] sm:$0xff]  ;;  %s264_s15 = scalar_select %p263_p10, %s659_s25, 1  ;;  %vm280_vm0 = vcmask 261120   ;;  %v333_v13 = vlaneseq  ;;  %v336_v20 = vstv %s484_s12 }
  0x14   : > { %296 = vmatpush.msra.mxu0 %v279_v0  ;;  %531 = vset.pattern.permute.xlu0 %v600_v2  ;;  %v276_v4 = vld [vmem:[%s770_s1] sm:$0xff]  ;;  %v601_v9 = vmov 32.0   ;;  %vm324_vm2 = vcmask 130048   ;;  %vm602_vm4 = vmmov 1  }
  0x15   : > { %s700_s18 = sshll.u32 %s264_s15, 3  ;;  %534 = vrcp.f32 %v601_v9  ;;  %v532_v15 = vld [vmem:[%s771_s2] ss:$0 sm:$0xff]  ;;  %v334_v17 = vshrl.u32 %v333_v13, 7  ;;  %v339_v25 = vand.u32 127, %v333_v13 }
  0x16   : > { %297 = vmatpush.msra.mxu0 %v278_v1  ;;  %s266_s26 = scalar_lea.vmem %s769_s0, %s700_s18  ;;  %s270_s9 = scalar_lea.vmem %s773_s4, %s700_s18  ;;  %v533_v29 = vld [vmem:[%s772_s3] ss:$0 sm:$0xff] }
  0x17   : > { %v275_v5 = vld [vmem:[%s266_s26] sm:$0xff]  ;;  %v337_v24 = vadd.s32 %v336_v20, %v334_v17  ;;  %s372_s26 = scalar_lea.hbm %s774_s5, %s484_s12 }
  0x18   : > { %298 = vmatpush.msra.mxu0 %v277_v3  ;;  %v304_v6 = vmul.f32 %v275_v5, %v275_v5  ;;  %v326_v8 = vld [vmem:[%s270_s9] sm:$0xff]  ;;  %s376_s29 = sshll.u32 %s372_s26, 4  ;;  %s358_s9 = scalar_lea.sflag [#allocation3], %s254_s13  ;;  %s377_s29 = int_to_ptr.hbm [resolvable:$true] %s376_s29 }
  0x19   : > { %vm340_vm3 = vcmp.eq.s32.totalorder %v337_v24, %v339_v25  ;;  %s550_s10 = sshra.s32 %s377_s29, 4  ;;  %s551_s10 = int_to_ptr.hbm [resolvable:$true] %s550_s10 }
  0x1a   : > { %299 = vmatpush.msra.mxu0 %v276_v4  ;;  %v305_v7 = vsel %vm280_vm0, %v304_v6, 0.0  ;;  %vm341_vm5 = vmxor %vm340_vm3, %vm602_vm4  ;;  %s552_s25 = scalar_lea.hbm %s551_s10, 8  ;;  %p557_p0 = scmp.lt.s32.totalorder %s551_s10, %s774_s5 }
  0x1b   : > { %483 = vmatmul.msk.f32.vlgmr.msra.gmra.mxu0 %vm280_vm0, %v275_v5  ;;  %306 = vadd.xlane.f32.xlu0 %v305_v7  ;;  %v535_v10 = vpop.eup %534  ;;  %p553_p11 = scmp.ne.s32.totalorder %s551_s10, %s552_s25  ;;  %p558_p1 = scmp.lt.s32.totalorder %s556_s14, %s552_s25 }
  0x1c   : > { %v317_v11 = vmul.f32 32.0, %v535_v10  ;;  %vm321_vm1 = vweird.f32 %v535_v10 }
  0x1d   : > { %p554_p12 = pnand %p553_p11, %p676_p5  ;;  %p559_p2 = por %p558_p1, %p557_p0 }
  0x1e   : > { %v318_v12 = vsub.f32 1.0, %v317_v11 }
  0x1f   : > { %p555_p13 = pneg %p554_p12 }
  0x20   : > { %v319_v14 = vmul.f32 %v535_v10, %v318_v12 }
  0x21   : > { %p560_p3 = pnand %p559_p2, %p555_p13 }
  0x22   : > { %v320_v19 = vadd.f32 %v535_v10, %v319_v14 }
  0x24   : > { %v322_v26 = vsel %vm321_vm1, %v535_v10, %v320_v19 }
  0x2f   : > { %329 = vperm.xlu0 %531, %v326_v8  }
  0x8e   : > { %v307_v16 = vpop.xlane.xlu0 %306 }
  0x8f   : > { %v312_v21 = vadd.f32 %v532_v15, %v307_v16 }
  0x98   : > { %v301_v18 = vpop.f32.mrf.mxu0 }
  0x99   : > { %v313_v22 = vmul.f32 2.0, %v301_v18 }
  0x9b   : > { %v314_v23 = vsub.f32 %v312_v21, %v313_v22 }
  0x9d   : > { %v315_v27 = vmax.f32 %v314_v23, 0.0 }
  0x9f   : > { %v323_v28 = vmul.f32 %v322_v26, %v315_v27 }
  0xa1   : > { %325 = vst.msk [vmem:[%s256_s17] sm:$0xff] %vm324_vm2, %v323_v28  ;;  %v330_v30 = vpop.permute.xlu0 %329 }
  0xa2   : > { %vm332_vm6 = vcmp.eq.s32.totalorder %v330_v30, %v533_v29 }
  0xa3   : > { %vm342_vm7 = vmand %vm332_vm6, %vm341_vm5 }
  0xa4   : > { %v344_v31 = vsel %vm342_vm7, %v323_v28, -inf  ;;  %vm729_vm8 = vmxor %vm332_vm6, %vm602_vm4 }
  0xa5   : > { %v345_v32 = vsel %vm324_vm2, %v344_v31, -inf  ;;  %v348_v34 = vsel %vm729_vm8, %v323_v28, inf }
  0xa6   : > { %346 = vmax.xlane.f32.xlu1 %v345_v32 }
  0xa7   : > { %563 = shalt.err (!%p560_p3)
}
  0xa8   : > { %489 = dma.vmem_to_hbm [thread:$0]  (%p676_p5), %s375_s28, 128, %s377_s29, %s358_s9   ;;  %v349_v35 = vsel %vm324_vm2, %v348_v34, inf  ;;  %vm355_vm9 = vcmask 7168  }
  0xa9   : > { %s274_s19 = scalar_lea.vmem %s775_s6, %s700_s18 }
  0xae   : > { %350 = vmin.xlane.f32.xlu1 %v349_v35 }
 0x119   : > { %v347_v36 = vpop.xlane.xlu1 %346 }
 0x121   : > { %v351_v37 = vpop.xlane.xlu1 %350 }
 0x122   : > { %v352_v38 = vsub.f32 %v347_v36, %v351_v37 }
 0x124   : > { %v353_v39 = vadd.f32 0.5, %v352_v38 }
 0x126   : > { %v354_v40 = vmax.f32 %v353_v39, 0.0 }
 0x128   : > { %356 = vst.msk [vmem:[%s274_s19] sm:$0xff] %vm355_vm9, %v354_v40 }
 0x129 PF: > { %p495_p4 = scmp.ge.s32.totalorder %s598_s24, 2  ;;  %s391_s7 = sand.u32 1, %s586_s21  }
 0x12a   : > { %s392_s20 = scalar_lea.sflag [#allocation3], %s391_s7 }
 0x12b   : > { %p492_p5 = pnand %p495_p4, %p680_p6 }
 0x12d   : > { %p493_p7 = pneg %p492_p5 }
 0x12f   : > { %581 = dma.done.wait (%p493_p7), %s392_s20, 128  }
 0x130   : > { %583 = vsyncadd (%p493_p7), %s392_s20, 4294967168  ;;  %p17_p8 = scmp.ge.s32.totalorder %s663_s27, 4   ;;  %s780_s21 = smov %s590_s22 }
 0x131   : > { %s781_s22 = smov %s594_s23  ;;  %s782_s23 = smov %s674_s30 }
 0x132   : > { %s783_s24 = smov %s663_s27  ;;  %19 = sbr.rel (!%p17_p8) target bundleno = 3 (0x3), region = 90 }
 0x137   :  { %405 = vsyncpa [#allocation3], 1 }
 0x138   :  { %407 = vsyncpa [#allocation3 + $0x1], 1 }

</bundles_post_ra>
